<compile_context>
chip_gen: v7x
topology: tpu7x:2x2x1
jax: 0.10.0
libtpu: 0.0.40
codegen_flags: <defaults>
</compile_context>

<pallas_src>
import jax
import jax.numpy as jnp
from jax.experimental import pallas as pl
from jax.experimental.pallas import tpu as pltpu


def _attention_kernel(x_ref, w_ref, pos_ref, out_ref):
    # x: (Bt, S, F); w: (1, F); pos: (1, S) = positional bias + fc bias (pre-folded)
    x = x_ref[...].astype(jnp.float32)               # upcast once (v5e has no bf16 VPU)
    w = w_ref[...]                                   # (1, F) f32
    pos = pos_ref[...]                               # (1, S) f32

    # Linear projection to one logit per position: VPU multiply + lane reduction
    # over F (avoids a degenerate (F,1) MXU matmul and any (.., 1) intermediates).
    scores = jnp.sum(x * w[:, None, :], axis=-1)     # (Bt, S), lane-dense over S
    scores = scores + pos                            # bias add (fc bias folded in)

    aw = jnp.exp(jnp.tanh(scores))                   # (Bt, S)
    denom = jnp.sum(aw, axis=-1, keepdims=True) + 1e-07   # (Bt, 1)

    # Weighted pooling over the sequence axis; normalization folded into epilogue.
    pooled = jnp.sum(aw[:, :, None] * x, axis=1)     # (Bt, F)
    out_ref[...] = (pooled * pl.reciprocal(denom, approx=False)).astype(out_ref.dtype)


def attention_forward(rnn_output, fc_weight, fc_bias, pos_bias, *, block_b=None):
    """rnn_output: (B, S, F); fc_weight: (1, F); fc_bias: (1,); pos_bias: (1, maxlen, 1)."""
    B, S, F = rnn_output.shape
    itemsize = jnp.dtype(rnn_output.dtype).itemsize

    # Lane-dense parameter prep (layout plumbing only).
    w = fc_weight.astype(jnp.float32).reshape(1, F)                       # (1, F)
    pos = (pos_bias[:, :S, 0] + fc_bias).astype(jnp.float32).reshape(1, S)  # (1, S)

    # Batch tile selection: target ~4 MiB of x per block so double-buffering fits
    # comfortably under every generation's scoped VMEM (16 MiB v5e default,
    # 32 MiB v6e/v7x default, 64 MiB physical on v7x).
    if block_b is None:
        target_bytes = 4 * 1024 * 1024
        rows = max(1, target_bytes // max(S * F * itemsize, 1))
        block_b = B if rows >= B else max(8, (rows // 8) * 8)
    block_b = min(int(block_b), B)
    if block_b < B:
        # (8,128) rule: the (Bt, F) output block's sublane dim must be a multiple of 8
        # unless it equals the full batch dim.
        block_b = max(8, (block_b // 8) * 8)
    grid_b = pl.cdiv(B, block_b)

    # Explicit VMEM budget: double-buffered x block (+ its f32 upcast), output
    # block, params, with 2x headroom; clamped to stay safe on v7x's 64 MiB VMEM.
    vmem_bytes = (2 * block_b * S * F * itemsize      # x double buffer
                  + 2 * block_b * S * F * 4           # f32 compute copy
                  + 2 * block_b * F * itemsize        # out double buffer
                  + (S + F) * 4)                      # params
    vmem_limit = int(min(max(2 * vmem_bytes, 16 << 20), 48 << 20))

    return pl.pallas_call(
        _attention_kernel,
        out_shape=jax.ShapeDtypeStruct((B, F), rnn_output.dtype),
        grid=(grid_b,),
        in_specs=[
            pl.BlockSpec((block_b, S, F), lambda i: (i, 0, 0)),  # x, tiled over batch
            pl.BlockSpec((1, F), lambda i: (0, 0)),              # fc weight row (resident)
            pl.BlockSpec((1, S), lambda i: (0, 0)),              # pos + fc bias row (resident)
        ],
        out_specs=pl.BlockSpec((block_b, F), lambda i: (i, 0)),
        compiler_params=pltpu.CompilerParams(
            dimension_semantics=("parallel",),   # v7x: shard batch over 2 TCs
            vmem_limit_bytes=vmem_limit,
        ),
    )(rnn_output, w, pos)


def attention_reference(rnn_output, fc_weight, fc_bias, pos_bias):
    """Pure-JAX reference mirroring the PyTorch forward."""
    S = rnn_output.shape[1]
    aw = rnn_output @ fc_weight.T + fc_bias                     # (B, S, 1)
    aw = pos_bias[:, :S, :] + aw
    aw = jnp.exp(jnp.tanh(aw))
    aw = aw / (jnp.sum(aw, axis=1, keepdims=True) + 1e-07)
    return jnp.sum(aw * rnn_output, axis=1)


if __name__ == "__main__":
    MAXLEN = 70

    key = jax.random.PRNGKey(0)
    k_x, k_w, k_b, k_x2 = jax.random.split(key, 4)

    # Small shape consistent with the module's (batch, seq_len, feature) layout.
    B, S, F = 2, 8, 32
    x = jax.random.normal(k_x, (B, S, F), dtype=jnp.float32)

    # Deterministic parameter init (nn.Linear(feature_dim, 1) bounds; torch inits
    # the (1, maxlen, 1) positional bias to zeros).
    bound = 1.0 / (F ** 0.5)
    fc_weight = jax.random.uniform(k_w, (1, F), jnp.float32, -bound, bound)
    fc_bias = jax.random.uniform(k_b, (1,), jnp.float32, -bound, bound)
    pos_bias = jnp.zeros((1, MAXLEN, 1), dtype=jnp.float32)

    out = jax.block_until_ready(attention_forward(x, fc_weight, fc_bias, pos_bias))
    ref = attention_reference(x, fc_weight, fc_bias, pos_bias)
    assert out.shape == (B, F)
    assert jnp.allclose(out, ref, atol=1e-5, rtol=1e-5), "mismatch vs reference (f32)"

    # Second check: exercises the batch grid (multiple blocks incl. a masked
    # partial block) and a bf16 input (HBM-traffic win, f32 compute in-kernel).
    B2, S2, F2 = 20, 12, 64
    x2 = jax.random.normal(k_x2, (B2, S2, F2), dtype=jnp.float32)
    bound2 = 1.0 / (F2 ** 0.5)
    fc_w2 = jax.random.uniform(k_w, (1, F2), jnp.float32, -bound2, bound2)
    fc_b2 = jax.random.uniform(k_b, (1,), jnp.float32, -bound2, bound2)
    x2_bf16 = x2.astype(jnp.bfloat16)
    out2 = jax.block_until_ready(
        attention_forward(x2_bf16, fc_w2, fc_b2, pos_bias, block_b=8))
    ref2 = attention_reference(x2_bf16.astype(jnp.float32), fc_w2, fc_b2, pos_bias)
    assert out2.shape == (B2, F2)
    assert jnp.allclose(out2.astype(jnp.float32), ref2, atol=2e-2, rtol=2e-2), \
        "mismatch vs reference (bf16, tiled)"

    print("KERNEL_OK")
</pallas_src>

<mosaic_0001>
module attributes {stable_mosaic.version = 11 : i64} {
  func.func @_attention_kernel(%arg0: i32, %arg1: memref<2x8x32xf32, #tpu.memory_space<vmem>>, %arg2: memref<1x32xf32, #tpu.memory_space<vmem>>, %arg3: memref<1x8xf32, #tpu.memory_space<vmem>>, %arg4: memref<2x32xf32, #tpu.memory_space<vmem>>) attributes {dimension_semantics = [#tpu.dimension_semantics<parallel>], iteration_bounds = array<i64: 1>, scalar_prefetch = 0 : i64, scratch_operands = 0 : i64, tpu.core_type = #tpu.core_type<tc>, window_params = [{transform_indices = @transform_0, window_bounds = array<i64: 2, 8, 32>}, {pipeline_mode = #tpu.pipeline_mode<synchronous>, transform_indices = @transform_1, window_bounds = array<i64: 1, 32>}, {pipeline_mode = #tpu.pipeline_mode<synchronous>, transform_indices = @transform_2, window_bounds = array<i64: 1, 8>}, {transform_indices = @transform_3, window_bounds = array<i64: 2, 32>}]} {
    %c0 = arith.constant 0 : index
    %c0_0 = arith.constant 0 : index
    %c0_1 = arith.constant 0 : index
    %0 = vector.load %arg1[%c0, %c0_0, %c0_1] : memref<2x8x32xf32, #tpu.memory_space<vmem>>, vector<2x8x32xf32>
    %c0_2 = arith.constant 0 : index
    %c0_3 = arith.constant 0 : index
    %1 = vector.load %arg2[%c0_2, %c0_3] : memref<1x32xf32, #tpu.memory_space<vmem>>, vector<1x32xf32>
    %c0_4 = arith.constant 0 : index
    %c0_5 = arith.constant 0 : index
    %2 = vector.load %arg3[%c0_4, %c0_5] : memref<1x8xf32, #tpu.memory_space<vmem>>, vector<1x8xf32>
    %3 = vector.shape_cast %1 : vector<1x32xf32> to vector<1x1x32xf32>
    %4 = vector.broadcast %3 : vector<1x1x32xf32> to vector<2x8x32xf32>
    %5 = arith.mulf %0, %4 : vector<2x8x32xf32>
    %cst = arith.constant dense<0.000000e+00> : vector<2x8xf32>
    %6 = vector.multi_reduction <add>, %5, %cst [2] : vector<2x8x32xf32> to vector<2x8xf32>
    %7 = vector.broadcast %2 : vector<1x8xf32> to vector<2x8xf32>
    %8 = arith.addf %6, %7 : vector<2x8xf32>
    %9 = math.tanh %8 : vector<2x8xf32>
    %10 = math.exp %9 : vector<2x8xf32>
    %cst_6 = arith.constant dense<0.000000e+00> : vector<2xf32>
    %11 = vector.multi_reduction <add>, %10, %cst_6 [1] : vector<2x8xf32> to vector<2xf32>
    %12 = vector.shape_cast %11 : vector<2xf32> to vector<2x1xf32>
    %cst_7 = arith.constant 1.000000e-07 : f32
    %13 = vector.broadcast %cst_7 : f32 to vector<2x1xf32>
    %14 = arith.addf %12, %13 : vector<2x1xf32>
    %15 = vector.shape_cast %10 : vector<2x8xf32> to vector<2x8x1xf32>
    %16 = vector.broadcast %15 : vector<2x8x1xf32> to vector<2x8x32xf32>
    %17 = arith.mulf %16, %0 : vector<2x8x32xf32>
    %cst_8 = arith.constant dense<0.000000e+00> : vector<2x32xf32>
    %18 = vector.multi_reduction <add>, %17, %cst_8 [1] : vector<2x8x32xf32> to vector<2x32xf32>
    %19 = tpu.reciprocal %14 : vector<2x1xf32> -> vector<2x1xf32>
    %20 = vector.broadcast %19 : vector<2x1xf32> to vector<2x32xf32>
    %21 = arith.mulf %18, %20 : vector<2x32xf32>
    %c0_9 = arith.constant 0 : index
    %c0_10 = arith.constant 0 : index
    %22 = vector.load %arg4[%c0_9, %c0_10] : memref<2x32xf32, #tpu.memory_space<vmem>>, vector<2x32xf32>
    tpu.vector_store %arg4[%c0_9, %c0_10], %21 {strides = array<i32>} : memref<2x32xf32, #tpu.memory_space<vmem>>, vector<2x32xf32>,
    return
  }
  func.func @transform_0(%arg0: i32) -> (i32, i32, i32) {
    %c0_i32 = arith.constant 0 : i32
    %c0_i32_0 = arith.constant 0 : i32
    %c0_i32_1 = arith.constant 0 : i32
    return %arg0, %c0_i32, %c0_i32_0 : i32, i32, i32
  }
  func.func @transform_1(%arg0: i32) -> (i32, i32) {
    %c0_i32 = arith.constant 0 : i32
    %c0_i32_0 = arith.constant 0 : i32
    %c0_i32_1 = arith.constant 0 : i32
    return %c0_i32, %c0_i32_0 : i32, i32
  }
  func.func @transform_2(%arg0: i32) -> (i32, i32) {
    %c0_i32 = arith.constant 0 : i32
    %c0_i32_0 = arith.constant 0 : i32
    %c0_i32_1 = arith.constant 0 : i32
    return %c0_i32, %c0_i32_0 : i32, i32
  }
  func.func @transform_3(%arg0: i32) -> (i32, i32) {
    %c0_i32 = arith.constant 0 : i32
    %c0_i32_0 = arith.constant 0 : i32
    return %arg0, %c0_i32 : i32, i32
  }
}

</mosaic_0001>

<bundles_post_ra>
// kernel: tpu_custom_call.1
= control target key start
LH: loop header
LB: loop body
LE: loop exit
PB: predicated region body
PF: predicated region fallthrough
CT: control target
= control target key end

     0   :  { %8 = vsyncpa [#allocation3], 0  ;;  %s266_s0 = inlined_call_operand.hbm [shape: f32[2,8,32], index: 0, kind: input, shape index: {}]   ;;  %s267_s1 = inlined_call_operand.vmem [shape: f32[1,32], index: 1, kind: input, shape index: {}]   ;;  %s268_s2 = inlined_call_operand.vmem [shape: f32[1,8], index: 2, kind: input, shape index: {}]   ;;  %s269_s3 = inlined_call_operand.hbm [shape: f32[2,32], index: 3, kind: output, shape index: {}]  }
   0x1   :  { %9 = vsyncpa [#allocation4], 0  ;;  %s205_s12 = smov [#allocation2]   ;;  %s157_s16 = scalar_lea.hbm %s266_s0, 256 }
   0x2   :  { %s15_s13 = sshll.u32 %s205_s12, 4  ;;  %p158_p0 = scmp.ne.s32.totalorder %s266_s0, %s157_s16  ;;  %s16_s13 = int_to_ptr.vmem [resolvable:$true] %s15_s13 }
   0x3   :  { %p161_p1 = scmp.lt.u32.totalorder %s157_s16, %s266_s0 }
   0x5   :  { %p163_p2 = pnand %p161_p1, %p158_p0 }
   0x7   :  { %166 = shalt.err (!%p163_p2)
}
   0x8   :  { %s167_s21 = scalar_lea.vmem %s16_s13, 256  ;;  %p172_p4 = scmp.lt.s32.totalorder %s16_s13, %s16_s13 }
   0x9   :  { %p168_p3 = scmp.ne.s32.totalorder %s16_s13, %s167_s21  ;;  %p173_p5 = scmp.lt.s32.totalorder %s167_s21, %s167_s21 }
   0xb   :  { %p174_p6 = por %p173_p5, %p172_p4 }
   0xd   :  { %p175_p7 = pnand %p174_p6, %p168_p3 }
   0xf   :  { %178 = shalt.err (!%p175_p7)
}
  0x10   :  { %s206_s22 = smov 128   ;;  %s207_s23 = smov 8  }
  0x11   :  { %21 = dma.hbm_to_vmem [thread:$0]  %s266_s0, 256, %s16_s13, [#allocation3], %s206_s22, %s206_s22, %s207_s23  }
  0x12   :  { %201 = dma.done.wait [#allocation3], 256  }
  0x13   :  { %202 = vsyncadd [#allocation3], 4294967040  ;;  %v29_v0 = vld [vmem:[#allocation2] sm:$0xff]  ;;  %vm41_vm0 = vcmask 261120   ;;  %v30_v2 = vld [vmem:[#allocation2 + $0x8] sm:$0xff]  ;;  %v208_v8 = vmov 0   ;;  %v73_v20 = vlaneseq }
  0x14   :  { %v138_v1 = vld [vmem:[%s267_s1] ss:$0 sm:$0xff]  ;;  %145 = vset.pattern.permute.xlu1 %v208_v8  ;;  %146 = vset.pattern.permute.xlu0 %v208_v8  ;;  %vm83_vm1 = vcmask 1041409   ;;  %vm86_vm2 = vcmask 58368   ;;  %s209_s0 = smov [#allocation5]   ;;  %vm121_vm3 = vcmask 254976  }
  0x15   :  { %v39_v3 = vmul.f32 %v138_v1, %v29_v0  ;;  %v40_v4 = vmul.f32 %v138_v1, %v30_v2  ;;  %v139_v5 = vld [vmem:[%s268_s2] ss:$0 sm:$0xff]  ;;  %v74_v21 = vand.u32 127, %v73_v20  ;;  %v76_v22 = vshrl.u32 %v73_v20, 7  ;;  %s129_s1 = sshll.u32 %s209_s0, 4  ;;  %s130_s1 = int_to_ptr.vmem [resolvable:$true] %s129_s1 }
  0x16   :  { %54 = vbcast.lane.b32.xlu1 %v139_v5, 256  ;;  %s179_s2 = scalar_lea.vmem %s130_s1, 32  ;;  %p184_p9 = scmp.lt.s32.totalorder %s130_s1, %s130_s1 }
  0x17   :  { %v42_v6 = vsel %vm41_vm0, %v39_v3, 0.0  ;;  %v45_v7 = vsel %vm41_vm0, %v40_v4, 0.0  ;;  %v77_v23 = vsub.s32 %v74_v21, %v76_v22  ;;  %p180_p8 = scmp.ne.s32.totalorder %s130_s1, %s179_s2  ;;  %p185_p10 = scmp.lt.s32.totalorder %s179_s2, %s179_s2 }
  0x18   :  { %43 = vadd.xlane.f32.xlu0 %v42_v6 }
  0x19   :  { %p186_p11 = por %p185_p10, %p184_p9 }
  0x1b   :  { %p187_p12 = pnand %p186_p11, %p180_p8 }
  0x1c   :  { %46 = vadd.xlane.f32.xlu0 %v45_v7 }
  0x88   :  { %v55_v9 = vpop.permute.xlu1 %54 }
  0xa5   :  { %v44_v10 = vpop.xlane.xlu0 %43 }
  0xa6   :  { %v57_v11 = vadd.f32 %v55_v9, %v44_v10 }
  0xa8   :  { %147 = vtanh.f32 %v57_v11 }
  0xa9   :  { %v47_v12 = vpop.xlane.xlu0 %46 }
  0xaa   :  { %v58_v13 = vadd.f32 %v55_v9, %v47_v12 }
  0xac   :  { %149 = vtanh.f32 %v58_v13 }
  0xb2   :  { %v148_v14 = vpop.eup %147 }
  0xb3   :  { %v61_v15 = vmul.f32 1.442695, %v148_v14 }
  0xb5   :  { %151 = vpow2.f32 %v61_v15 }
  0xb6   :  { %v150_v16 = vpop.eup %149 }
  0xb7   :  { %v63_v17 = vmul.f32 1.442695, %v150_v16 }
  0xb9   :  { %153 = vpow2.f32 %v63_v17 }
  0xbf   :  { %v152_v18 = vpop.eup %151 }
  0xc0   :  { %68 = vperm.xlu1 %145, %v152_v18  }
  0xc3   :  { %v154_v19 = vpop.eup %153 }
  0xc4   :  { %71 = vperm.xlu0 %146, %v154_v19  }
 0x13f   :  { %v69_v24 = vpop.permute.xlu1 %68 }
 0x140   :  { %v78_v26 = vrot.slane %v69_v24, %v77_v23  ;;  %v93_v31 = vmul.f32 %v69_v24, %v29_v0 }
 0x142   :  { %v95_v33 = vsel %vm41_vm0, %v93_v31, 0.0 }
 0x143   :  { %v72_v25 = vpop.permute.xlu0 %71  ;;  %v96_v35 = vrot.slane %v95_v33, 4 }
 0x144   :  { %v82_v27 = vrot.slane %v72_v25, %v77_v23  ;;  %v94_v30 = vmul.f32 %v72_v25, %v30_v2 }
 0x145   :  { %v97_v37 = vadd.f32 %v96_v35, %v95_v33 }
 0x146   :  { %v84_v28 = vsel %vm83_vm1, %v82_v27, %v78_v26  ;;  %v102_v32 = vsel %vm41_vm0, %v94_v30, 0.0 }
 0x147   :  { %v87_v29 = vsel %vm86_vm2, %v84_v28, 0.0  ;;  %v103_v34 = vrot.slane %v102_v32, 4  ;;  %v98_v41 = vrot.slane %v97_v37, 2 }
 0x148   :  { %88 = vadd.xlane.f32.xlu1 %v87_v29 }
 0x149   :  { %v104_v36 = vadd.f32 %v103_v34, %v102_v32  ;;  %v99_v43 = vadd.f32 %v98_v41, %v97_v37 }
 0x14b   :  { %v105_v40 = vrot.slane %v104_v36, 2  ;;  %v100_v45 = vrot.slane %v99_v43, 1 }
 0x14d   :  { %v106_v42 = vadd.f32 %v105_v40, %v104_v36  ;;  %v101_v49 = vadd.f32 %v100_v45, %v99_v43 }
 0x14f   :  { %v107_v44 = vrot.slane %v106_v42, 1 }
 0x151   :  { %v108_v47 = vadd.f32 %v107_v44, %v106_v42 }
 0x1d5   :  { %v89_v38 = vpop.xlane.xlu1 %88 }
 0x1d6   :  { %v90_v39 = vadd.f32 1e-07, %v89_v38 }
 0x1d8   :  { %155 = vrcp.f32 %v90_v39 }
 0x1e2   :  { %v156_v46 = vpop.eup %155 }
 0x1e3   :  { %v111_v48 = vrot.slane %v156_v46, 1  ;;  %v114_v51 = vmul.f32 %v156_v46, %v101_v49 }
 0x1e5   :  { %v115_v50 = vmul.f32 %v111_v48, %v108_v47 }
 0x1e7   :  { %v118_v52 = vrot.slane %v115_v50, 7 }
 0x1e9   :  { %v119_v53 = vsel %vm83_vm1, %v118_v52, %v114_v51 }
 0x1ea   :  { %122 = vst.msk [vmem:[#allocation5] sm:$0x3] %vm121_vm3, %v119_v53 }
 0x1eb   :  { %190 = shalt.err (!%p187_p12)
}
 0x1ec   :  { %s191_s5 = scalar_lea.hbm %s269_s3, 32 }
 0x1ed   :  { %p192_p13 = scmp.ne.s32.totalorder %s269_s3, %s191_s5  ;;  %p195_p0 = scmp.lt.u32.totalorder %s191_s5, %s269_s3 }
 0x1ef   :  { %p197_p1 = pnand %p195_p0, %p192_p13 }
 0x1f1   :  { %200 = shalt.err (!%p197_p1)
}
 0x1f2   :  { %132 = dma.vmem_to_hbm [thread:$0]  %s130_s1, 32, %s269_s3, [#allocation4]  }
 0x1f3   :  { %203 = dma.done.wait [#allocation4], 32  }
 0x1f4   :  { %204 = vsyncadd [#allocation4], 4294967264 }
 0x1f5   :  { %136 = vsyncpa [#allocation3], 1 }
 0x1f6   :  { %137 = vsyncpa [#allocation4], 1 }

</bundles_post_ra>
